<compile_context>
chip_gen: v5e
topology: v5e:2x2
jax: 0.10.0
libtpu: 0.0.40
codegen_flags: <defaults>
</compile_context>

<pallas_src>
import math
from functools import partial

import jax
import jax.numpy as jnp
from jax import lax
from jax.experimental import pallas as pl
from jax.experimental.pallas import tpu as pltpu


def _cross_attention_kernel(x_ref, y_ref,
                            wq_ref, bq_ref,
                            wk_ref, bk_ref,
                            wv_ref, bv_ref,
                            wo_ref, bo_ref,
                            o_ref,
                            *, n_heads, d_head, lq, lkv, tb, approx_recip):
    cdt = wq_ref.dtype                       # compute (MXU operand) dtype
    scale = 1.0 / math.sqrt(d_head)

    x = x_ref[...].astype(cdt)               # (tb*lq,  d_embed)
    y = y_ref[...].astype(cdt)               # (tb*lkv, d_cross)

    # --- in-projections over the whole batch tile (dense M for the MXU) ---
    q = (jnp.dot(x, wq_ref[...], preferred_element_type=jnp.float32)
         + bq_ref[...]).astype(cdt)          # (tb*lq,  d_embed)
    k = (jnp.dot(y, wk_ref[...], preferred_element_type=jnp.float32)
         + bk_ref[...]).astype(cdt)          # (tb*lkv, d_embed)
    v = (jnp.dot(y, wv_ref[...], preferred_element_type=jnp.float32)
         + bv_ref[...]).astype(cdt)          # (tb*lkv, d_embed)

    # --- per (batch, head) attention with static sublane/lane slices ---
    # contract last dims of both operands: q_h @ k_h^T without explicit transpose
    dn_nt = (((1,), (1,)), ((), ()))
    ctx_rows = []
    for b in range(tb):
        qb = q[b * lq:(b + 1) * lq]          # (lq,  d_embed)
        kb = k[b * lkv:(b + 1) * lkv]        # (lkv, d_embed)
        vb = v[b * lkv:(b + 1) * lkv]        # (lkv, d_embed)
        heads = []
        for h in range(n_heads):
            sl = slice(h * d_head, (h + 1) * d_head)
            s = lax.dot_general(qb[:, sl], kb[:, sl], dn_nt,
                                preferred_element_type=jnp.float32) * scale
            m = jnp.max(s, axis=-1, keepdims=True)
            e = jnp.exp(s - m)
            denom = jnp.sum(e, axis=-1, keepdims=True)
            p = (e * pl.reciprocal(denom, approx=approx_recip)).astype(cdt)
            heads.append(jnp.dot(p, vb[:, sl],
                                 preferred_element_type=jnp.float32))
        ctx_rows.append(jnp.concatenate(heads, axis=-1))  # (lq, d_embed)
    ctx = jnp.concatenate(ctx_rows, axis=0).astype(cdt)   # (tb*lq, d_embed)

    # --- output projection ---
    out = jnp.dot(ctx, wo_ref[...], preferred_element_type=jnp.float32) + bo_ref[...]
    o_ref[...] = out.astype(o_ref.dtype)


def _pick_batch_tile(B, lq, lkv):
    """Largest-useful divisor of B: prefer tiles whose row count reaches ~128
    (dense MXU M-dim) while keeping (8,128)-compatible block row counts."""
    divisors = [t for t in range(min(B, 32), 0, -1) if B % t == 0]

    def ok(t):
        return t == B or ((t * lq) % 8 == 0 and (t * lkv) % 8 == 0)

    # smallest divisor that already gives >=128 projection rows
    for t in sorted(divisors):
        if ok(t) and t * lq >= 128:
            return t
    # otherwise the largest legal divisor (fold as many batches as possible)
    for t in divisors:
        if ok(t):
            return t
    return B


def cross_attention(x, y, params, *, n_heads, compute_dtype=jnp.bfloat16):
    """x: (B, Lq, d_embed), y: (B, Lkv, d_cross). params: dict of transposed
    (in, out) weights and (1, out) f32 biases."""
    B, Lq, d_embed = x.shape
    _, Lkv, d_cross = y.shape
    assert d_embed % n_heads == 0
    d_head = d_embed // n_heads

    tb = _pick_batch_tile(B, Lq, Lkv)
    grid = (B // tb,)

    # cast MXU weight operands (halves DMA bytes + VMEM for weights); biases f32
    wq = params['wq'].astype(compute_dtype)
    wk = params['wk'].astype(compute_dtype)
    wv = params['wv'].astype(compute_dtype)
    wo = params['wo'].astype(compute_dtype)
    bq, bk, bv, bo = params['bq'], params['bk'], params['bv'], params['bo']

    # flatten batch+sequence so each grid step sees dense 2-D row slabs
    x2d = x.reshape(B * Lq, d_embed)
    y2d = y.reshape(B * Lkv, d_cross)

    full = lambda *shape: pl.BlockSpec(shape, lambda i: tuple(0 for _ in shape))

    approx_recip = jnp.dtype(compute_dtype) != jnp.dtype(jnp.float32)
    kernel = partial(_cross_attention_kernel,
                     n_heads=n_heads, d_head=d_head,
                     lq=Lq, lkv=Lkv, tb=tb, approx_recip=approx_recip)

    out2d = pl.pallas_call(
        kernel,
        out_shape=jax.ShapeDtypeStruct((B * Lq, d_embed), x.dtype),
        grid_spec=pltpu.PrefetchScalarGridSpec(
            num_scalar_prefetch=0,
            grid=grid,
            in_specs=[
                pl.BlockSpec((tb * Lq, d_embed), lambda i: (i, 0)),
                pl.BlockSpec((tb * Lkv, d_cross), lambda i: (i, 0)),
                full(d_embed, d_embed), full(1, d_embed),   # q_proj
                full(d_cross, d_embed), full(1, d_embed),   # k_proj
                full(d_cross, d_embed), full(1, d_embed),   # v_proj
                full(d_embed, d_embed), full(1, d_embed),   # out_proj
            ],
            out_specs=pl.BlockSpec((tb * Lq, d_embed), lambda i: (i, 0)),
        ),
        compiler_params=pltpu.CompilerParams(
            dimension_semantics=("parallel",)),
    )(x2d, y2d, wq, bq, wk, bk, wv, bv, wo, bo)

    return out2d.reshape(B, Lq, d_embed)


def init_params(key, d_embed, d_cross):
    """Deterministic synthetic parameters. PyTorch Linear weight is (out, in);
    we store the transposed (in, out) form plus (1, out) biases."""
    ks = jax.random.split(key, 8)

    def lin(kw, kb, d_in, d_out):
        bound = 1.0 / math.sqrt(d_in)
        w = jax.random.uniform(kw, (d_out, d_in), jnp.float32, -bound, bound)
        b = jax.random.uniform(kb, (d_out,), jnp.float32, -bound, bound)
        return w.T, b.reshape(1, d_out)

    wq, bq = lin(ks[0], ks[1], d_embed, d_embed)
    wk, bk = lin(ks[2], ks[3], d_cross, d_embed)
    wv, bv = lin(ks[4], ks[5], d_cross, d_embed)
    wo, bo = lin(ks[6], ks[7], d_embed, d_embed)
    return dict(wq=wq, bq=bq, wk=wk, bk=bk, wv=wv, bv=bv, wo=wo, bo=bo)


def cross_attention_ref(x, y, params, *, n_heads):
    """Pure-JAX f32 reference mirroring the PyTorch forward exactly."""
    B, Lq, d_embed = x.shape
    d_head = d_embed // n_heads
    q = x @ params['wq'] + params['bq'][0]
    k = y @ params['wk'] + params['bk'][0]
    v = y @ params['wv'] + params['bv'][0]
    q = q.reshape(B, Lq, n_heads, d_head).transpose(0, 2, 1, 3)
    k = k.reshape(B, -1, n_heads, d_head).transpose(0, 2, 1, 3)
    v = v.reshape(B, -1, n_heads, d_head).transpose(0, 2, 1, 3)
    w = jnp.einsum('bhqd,bhkd->bhqk', q, k) / math.sqrt(d_head)
    w = jax.nn.softmax(w, axis=-1)
    o = jnp.einsum('bhqk,bhkd->bhqd', w, v)
    o = o.transpose(0, 2, 1, 3).reshape(B, Lq, d_embed)
    return o @ params['wo'] + params['bo'][0]


if __name__ == "__main__":
    # small shapes consistent with the module's forward
    n_heads = 4
    d_embed = 32
    d_cross = 64
    B, Lq, Lkv = 2, 8, 16

    key = jax.random.PRNGKey(0)
    kx, ky, kp = jax.random.split(key, 3)
    x = jax.random.normal(kx, (B, Lq, d_embed), jnp.float32)
    y = jax.random.normal(ky, (B, Lkv, d_cross), jnp.float32)
    params = init_params(kp, d_embed, d_cross)

    ref = cross_attention_ref(x, y, params, n_heads=n_heads)

    # exactness check: f32 MXU operands + exact reciprocal
    out_f32 = cross_attention(x, y, params, n_heads=n_heads,
                              compute_dtype=jnp.float32)
    out_f32 = jax.block_until_ready(out_f32)
    assert out_f32.shape == (B, Lq, d_embed)
    assert jnp.allclose(out_f32, ref, atol=1e-4, rtol=1e-4), "f32 mismatch"

    # fast path: bf16 MXU operands, f32 accumulation, approx softmax reciprocal
    out = cross_attention(x, y, params, n_heads=n_heads,
                          compute_dtype=jnp.bfloat16)
    out = jax.block_until_ready(out)
    assert out.shape == (B, Lq, d_embed)
    assert jnp.allclose(out, ref, atol=3e-2, rtol=3e-2), "bf16 mismatch"

    print("KERNEL_OK")
</pallas_src>

<mosaic_0001>
module attributes {stable_mosaic.version = 11 : i64} {
  func.func @_cross_attention_kernel(%arg0: i32, %arg1: memref<16x32xf32, #tpu.memory_space<vmem>>, %arg2: memref<32x64xf32, #tpu.memory_space<vmem>>, %arg3: memref<32x32xf32, #tpu.memory_space<vmem>>, %arg4: memref<1x32xf32, #tpu.memory_space<vmem>>, %arg5: memref<64x32xf32, #tpu.memory_space<vmem>>, %arg6: memref<1x32xf32, #tpu.memory_space<vmem>>, %arg7: memref<64x32xf32, #tpu.memory_space<vmem>>, %arg8: memref<1x32xf32, #tpu.memory_space<vmem>>, %arg9: memref<32x32xf32, #tpu.memory_space<vmem>>, %arg10: memref<1x32xf32, #tpu.memory_space<vmem>>, %arg11: memref<16x32xf32, #tpu.memory_space<vmem>>) attributes {dimension_semantics = [#tpu.dimension_semantics<parallel>], iteration_bounds = array<i64: 1>, scalar_prefetch = 0 : i64, scratch_operands = 0 : i64, tpu.core_type = #tpu.core_type<tc>, window_params = [{transform_indices = @transform_0, window_bounds = array<i64: 16, 32>}, {transform_indices = @transform_1, window_bounds = array<i64: 32, 64>}, {pipeline_mode = #tpu.pipeline_mode<synchronous>, transform_indices = @transform_2, window_bounds = array<i64: 32, 32>}, {pipeline_mode = #tpu.pipeline_mode<synchronous>, transform_indices = @transform_3, window_bounds = array<i64: 1, 32>}, {pipeline_mode = #tpu.pipeline_mode<synchronous>, transform_indices = @transform_4, window_bounds = array<i64: 64, 32>}, {pipeline_mode = #tpu.pipeline_mode<synchronous>, transform_indices = @transform_5, window_bounds = array<i64: 1, 32>}, {pipeline_mode = #tpu.pipeline_mode<synchronous>, transform_indices = @transform_6, window_bounds = array<i64: 64, 32>}, {pipeline_mode = #tpu.pipeline_mode<synchronous>, transform_indices = @transform_7, window_bounds = array<i64: 1, 32>}, {pipeline_mode = #tpu.pipeline_mode<synchronous>, transform_indices = @transform_8, window_bounds = array<i64: 32, 32>}, {pipeline_mode = #tpu.pipeline_mode<synchronous>, transform_indices = @transform_9, window_bounds = array<i64: 1, 32>}, {transform_indices = @transform_10, window_bounds = array<i64: 16, 32>}]} {
    %c0 = arith.constant 0 : index
    %c0_0 = arith.constant 0 : index
    %0 = vector.load %arg1[%c0, %c0_0] : memref<16x32xf32, #tpu.memory_space<vmem>>, vector<16x32xf32>
    %c0_1 = arith.constant 0 : index
    %c0_2 = arith.constant 0 : index
    %1 = vector.load %arg2[%c0_1, %c0_2] : memref<32x64xf32, #tpu.memory_space<vmem>>, vector<32x64xf32>
    %c0_3 = arith.constant 0 : index
    %c0_4 = arith.constant 0 : index
    %2 = vector.load %arg3[%c0_3, %c0_4] : memref<32x32xf32, #tpu.memory_space<vmem>>, vector<32x32xf32>
    %cst = arith.constant dense<0.000000e+00> : vector<16x32xf32>
    %3 = tpu.matmul %0, %2, %cst {dimension_numbers = #tpu.dot_dimension_numbers<[1], [0], [0], [1], [0, 0, 1, 1], [], []>} : vector<16x32xf32>, vector<32x32xf32>, vector<16x32xf32> -> vector<16x32xf32>
    %c0_5 = arith.constant 0 : index
    %c0_6 = arith.constant 0 : index
    %4 = vector.load %arg4[%c0_5, %c0_6] : memref<1x32xf32, #tpu.memory_space<vmem>>, vector<1x32xf32>
    %5 = vector.broadcast %4 : vector<1x32xf32> to vector<16x32xf32>
    %6 = arith.addf %3, %5 : vector<16x32xf32>
    %c0_7 = arith.constant 0 : index
    %c0_8 = arith.constant 0 : index
    %7 = vector.load %arg5[%c0_7, %c0_8] : memref<64x32xf32, #tpu.memory_space<vmem>>, vector<64x32xf32>
    %cst_9 = arith.constant dense<0.000000e+00> : vector<32x32xf32>
    %8 = tpu.matmul %1, %7, %cst_9 {dimension_numbers = #tpu.dot_dimension_numbers<[1], [0], [0], [1], [0, 0, 1, 1], [], []>} : vector<32x64xf32>, vector<64x32xf32>, vector<32x32xf32> -> vector<32x32xf32>
    %c0_10 = arith.constant 0 : index
    %c0_11 = arith.constant 0 : index
    %9 = vector.load %arg6[%c0_10, %c0_11] : memref<1x32xf32, #tpu.memory_space<vmem>>, vector<1x32xf32>
    %10 = vector.broadcast %9 : vector<1x32xf32> to vector<32x32xf32>
    %11 = arith.addf %8, %10 : vector<32x32xf32>
    %c0_12 = arith.constant 0 : index
    %c0_13 = arith.constant 0 : index
    %12 = vector.load %arg7[%c0_12, %c0_13] : memref<64x32xf32, #tpu.memory_space<vmem>>, vector<64x32xf32>
    %cst_14 = arith.constant dense<0.000000e+00> : vector<32x32xf32>
    %13 = tpu.matmul %1, %12, %cst_14 {dimension_numbers = #tpu.dot_dimension_numbers<[1], [0], [0], [1], [0, 0, 1, 1], [], []>} : vector<32x64xf32>, vector<64x32xf32>, vector<32x32xf32> -> vector<32x32xf32>
    %c0_15 = arith.constant 0 : index
    %c0_16 = arith.constant 0 : index
    %14 = vector.load %arg8[%c0_15, %c0_16] : memref<1x32xf32, #tpu.memory_space<vmem>>, vector<1x32xf32>
    %15 = vector.broadcast %14 : vector<1x32xf32> to vector<32x32xf32>
    %16 = arith.addf %13, %15 : vector<32x32xf32>
    %17 = vector.extract_strided_slice %6 {offsets = [0, 0], sizes = [8, 32], strides = [1, 1]} : vector<16x32xf32> to vector<8x32xf32>
    %18 = vector.extract_strided_slice %11 {offsets = [0, 0], sizes = [16, 32], strides = [1, 1]} : vector<32x32xf32> to vector<16x32xf32>
    %19 = vector.extract_strided_slice %16 {offsets = [0, 0], sizes = [16, 32], strides = [1, 1]} : vector<32x32xf32> to vector<16x32xf32>
    %20 = vector.extract_strided_slice %17 {offsets = [0, 0], sizes = [8, 8], strides = [1, 1]} : vector<8x32xf32> to vector<8x8xf32>
    %21 = vector.extract_strided_slice %18 {offsets = [0, 0], sizes = [16, 8], strides = [1, 1]} : vector<16x32xf32> to vector<16x8xf32>
    %cst_17 = arith.constant dense<0.000000e+00> : vector<8x16xf32>
    %22 = tpu.matmul %20, %21, %cst_17 {dimension_numbers = #tpu.dot_dimension_numbers<[1], [1], [0], [0], [0, 0, 1, 0], [], []>} : vector<8x8xf32>, vector<16x8xf32>, vector<8x16xf32> -> vector<8x16xf32>
    %cst_18 = arith.constant 0.353553385 : f32
    %23 = vector.broadcast %cst_18 : f32 to vector<8x16xf32>
    %24 = arith.mulf %22, %23 : vector<8x16xf32>
    %cst_19 = arith.constant dense<0xFF800000> : vector<8xf32>
    %25 = vector.multi_reduction <maximumf>, %24, %cst_19 [1] : vector<8x16xf32> to vector<8xf32>
    %26 = vector.shape_cast %25 : vector<8xf32> to vector<8x1xf32>
    %27 = vector.broadcast %26 : vector<8x1xf32> to vector<8x16xf32>
    %28 = arith.subf %24, %27 : vector<8x16xf32>
    %29 = math.exp %28 : vector<8x16xf32>
    %cst_20 = arith.constant dense<0.000000e+00> : vector<8xf32>
    %30 = vector.multi_reduction <add>, %29, %cst_20 [1] : vector<8x16xf32> to vector<8xf32>
    %31 = vector.shape_cast %30 : vector<8xf32> to vector<8x1xf32>
    %32 = tpu.reciprocal %31 : vector<8x1xf32> -> vector<8x1xf32>
    %33 = vector.broadcast %32 : vector<8x1xf32> to vector<8x16xf32>
    %34 = arith.mulf %29, %33 : vector<8x16xf32>
    %35 = vector.extract_strided_slice %19 {offsets = [0, 0], sizes = [16, 8], strides = [1, 1]} : vector<16x32xf32> to vector<16x8xf32>
    %cst_21 = arith.constant dense<0.000000e+00> : vector<8x8xf32>
    %36 = tpu.matmul %34, %35, %cst_21 {dimension_numbers = #tpu.dot_dimension_numbers<[1], [0], [0], [1], [0, 0, 1, 1], [], []>} : vector<8x16xf32>, vector<16x8xf32>, vector<8x8xf32> -> vector<8x8xf32>
    %37 = vector.extract_strided_slice %17 {offsets = [0, 8], sizes = [8, 8], strides = [1, 1]} : vector<8x32xf32> to vector<8x8xf32>
    %38 = vector.extract_strided_slice %18 {offsets = [0, 8], sizes = [16, 8], strides = [1, 1]} : vector<16x32xf32> to vector<16x8xf32>
    %cst_22 = arith.constant dense<0.000000e+00> : vector<8x16xf32>
    %39 = tpu.matmul %37, %38, %cst_22 {dimension_numbers = #tpu.dot_dimension_numbers<[1], [1], [0], [0], [0, 0, 1, 0], [], []>} : vector<8x8xf32>, vector<16x8xf32>, vector<8x16xf32> -> vector<8x16xf32>
    %cst_23 = arith.constant 0.353553385 : f32
    %40 = vector.broadcast %cst_23 : f32 to vector<8x16xf32>
    %41 = arith.mulf %39, %40 : vector<8x16xf32>
    %cst_24 = arith.constant dense<0xFF800000> : vector<8xf32>
    %42 = vector.multi_reduction <maximumf>, %41, %cst_24 [1] : vector<8x16xf32> to vector<8xf32>
    %43 = vector.shape_cast %42 : vector<8xf32> to vector<8x1xf32>
    %44 = vector.broadcast %43 : vector<8x1xf32> to vector<8x16xf32>
    %45 = arith.subf %41, %44 : vector<8x16xf32>
    %46 = math.exp %45 : vector<8x16xf32>
    %cst_25 = arith.constant dense<0.000000e+00> : vector<8xf32>
    %47 = vector.multi_reduction <add>, %46, %cst_25 [1] : vector<8x16xf32> to vector<8xf32>
    %48 = vector.shape_cast %47 : vector<8xf32> to vector<8x1xf32>
    %49 = tpu.reciprocal %48 : vector<8x1xf32> -> vector<8x1xf32>
    %50 = vector.broadcast %49 : vector<8x1xf32> to vector<8x16xf32>
    %51 = arith.mulf %46, %50 : vector<8x16xf32>
    %52 = vector.extract_strided_slice %19 {offsets = [0, 8], sizes = [16, 8], strides = [1, 1]} : vector<16x32xf32> to vector<16x8xf32>
    %cst_26 = arith.constant dense<0.000000e+00> : vector<8x8xf32>
    %53 = tpu.matmul %51, %52, %cst_26 {dimension_numbers = #tpu.dot_dimension_numbers<[1], [0], [0], [1], [0, 0, 1, 1], [], []>} : vector<8x16xf32>, vector<16x8xf32>, vector<8x8xf32> -> vector<8x8xf32>
    %54 = vector.extract_strided_slice %17 {offsets = [0, 16], sizes = [8, 8], strides = [1, 1]} : vector<8x32xf32> to vector<8x8xf32>
    %55 = vector.extract_strided_slice %18 {offsets = [0, 16], sizes = [16, 8], strides = [1, 1]} : vector<16x32xf32> to vector<16x8xf32>
    %cst_27 = arith.constant dense<0.000000e+00> : vector<8x16xf32>
    %56 = tpu.matmul %54, %55, %cst_27 {dimension_numbers = #tpu.dot_dimension_numbers<[1], [1], [0], [0], [0, 0, 1, 0], [], []>} : vector<8x8xf32>, vector<16x8xf32>, vector<8x16xf32> -> vector<8x16xf32>
    %cst_28 = arith.constant 0.353553385 : f32
    %57 = vector.broadcast %cst_28 : f32 to vector<8x16xf32>
    %58 = arith.mulf %56, %57 : vector<8x16xf32>
    %cst_29 = arith.constant dense<0xFF800000> : vector<8xf32>
    %59 = vector.multi_reduction <maximumf>, %58, %cst_29 [1] : vector<8x16xf32> to vector<8xf32>
    %60 = vector.shape_cast %59 : vector<8xf32> to vector<8x1xf32>
    %61 = vector.broadcast %60 : vector<8x1xf32> to vector<8x16xf32>
    %62 = arith.subf %58, %61 : vector<8x16xf32>
    %63 = math.exp %62 : vector<8x16xf32>
    %cst_30 = arith.constant dense<0.000000e+00> : vector<8xf32>
    %64 = vector.multi_reduction <add>, %63, %cst_30 [1] : vector<8x16xf32> to vector<8xf32>
    %65 = vector.shape_cast %64 : vector<8xf32> to vector<8x1xf32>
    %66 = tpu.reciprocal %65 : vector<8x1xf32> -> vector<8x1xf32>
    %67 = vector.broadcast %66 : vector<8x1xf32> to vector<8x16xf32>
    %68 = arith.mulf %63, %67 : vector<8x16xf32>
    %69 = vector.extract_strided_slice %19 {offsets = [0, 16], sizes = [16, 8], strides = [1, 1]} : vector<16x32xf32> to vector<16x8xf32>
    %cst_31 = arith.constant dense<0.000000e+00> : vector<8x8xf32>
    %70 = tpu.matmul %68, %69, %cst_31 {dimension_numbers = #tpu.dot_dimension_numbers<[1], [0], [0], [1], [0, 0, 1, 1], [], []>} : vector<8x16xf32>, vector<16x8xf32>, vector<8x8xf32> -> vector<8x8xf32>
    %71 = vector.extract_strided_slice %17 {offsets = [0, 24], sizes = [8, 8], strides = [1, 1]} : vector<8x32xf32> to vector<8x8xf32>
    %72 = vector.extract_strided_slice %18 {offsets = [0, 24], sizes = [16, 8], strides = [1, 1]} : vector<16x32xf32> to vector<16x8xf32>
    %cst_32 = arith.constant dense<0.000000e+00> : vector<8x16xf32>
    %73 = tpu.matmul %71, %72, %cst_32 {dimension_numbers = #tpu.dot_dimension_numbers<[1], [1], [0], [0], [0, 0, 1, 0], [], []>} : vector<8x8xf32>, vector<16x8xf32>, vector<8x16xf32> -> vector<8x16xf32>
    %cst_33 = arith.constant 0.353553385 : f32
    %74 = vector.broadcast %cst_33 : f32 to vector<8x16xf32>
    %75 = arith.mulf %73, %74 : vector<8x16xf32>
    %cst_34 = arith.constant dense<0xFF800000> : vector<8xf32>
    %76 = vector.multi_reduction <maximumf>, %75, %cst_34 [1] : vector<8x16xf32> to vector<8xf32>
    %77 = vector.shape_cast %76 : vector<8xf32> to vector<8x1xf32>
    %78 = vector.broadcast %77 : vector<8x1xf32> to vector<8x16xf32>
    %79 = arith.subf %75, %78 : vector<8x16xf32>
    %80 = math.exp %79 : vector<8x16xf32>
    %cst_35 = arith.constant dense<0.000000e+00> : vector<8xf32>
    %81 = vector.multi_reduction <add>, %80, %cst_35 [1] : vector<8x16xf32> to vector<8xf32>
    %82 = vector.shape_cast %81 : vector<8xf32> to vector<8x1xf32>
    %83 = tpu.reciprocal %82 : vector<8x1xf32> -> vector<8x1xf32>
    %84 = vector.broadcast %83 : vector<8x1xf32> to vector<8x16xf32>
    %85 = arith.mulf %80, %84 : vector<8x16xf32>
    %86 = vector.extract_strided_slice %19 {offsets = [0, 24], sizes = [16, 8], strides = [1, 1]} : vector<16x32xf32> to vector<16x8xf32>
    %cst_36 = arith.constant dense<0.000000e+00> : vector<8x8xf32>
    %87 = tpu.matmul %85, %86, %cst_36 {dimension_numbers = #tpu.dot_dimension_numbers<[1], [0], [0], [1], [0, 0, 1, 1], [], []>} : vector<8x16xf32>, vector<16x8xf32>, vector<8x8xf32> -> vector<8x8xf32>
    %88 = tpu.concatenate %36, %53, %70, %87 in 1 : vector<8x8xf32>, vector<8x8xf32>, vector<8x8xf32>, vector<8x8xf32> -> vector<8x32xf32>
    %89 = vector.extract_strided_slice %6 {offsets = [8, 0], sizes = [8, 32], strides = [1, 1]} : vector<16x32xf32> to vector<8x32xf32>
    %90 = vector.extract_strided_slice %11 {offsets = [16, 0], sizes = [16, 32], strides = [1, 1]} : vector<32x32xf32> to vector<16x32xf32>
    %91 = vector.extract_strided_slice %16 {offsets = [16, 0], sizes = [16, 32], strides = [1, 1]} : vector<32x32xf32> to vector<16x32xf32>
    %92 = vector.extract_strided_slice %89 {offsets = [0, 0], sizes = [8, 8], strides = [1, 1]} : vector<8x32xf32> to vector<8x8xf32>
    %93 = vector.extract_strided_slice %90 {offsets = [0, 0], sizes = [16, 8], strides = [1, 1]} : vector<16x32xf32> to vector<16x8xf32>
    %cst_37 = arith.constant dense<0.000000e+00> : vector<8x16xf32>
    %94 = tpu.matmul %92, %93, %cst_37 {dimension_numbers = #tpu.dot_dimension_numbers<[1], [1], [0], [0], [0, 0, 1, 0], [], []>} : vector<8x8xf32>, vector<16x8xf32>, vector<8x16xf32> -> vector<8x16xf32>
    %cst_38 = arith.constant 0.353553385 : f32
    %95 = vector.broadcast %cst_38 : f32 to vector<8x16xf32>
    %96 = arith.mulf %94, %95 : vector<8x16xf32>
    %cst_39 = arith.constant dense<0xFF800000> : vector<8xf32>
    %97 = vector.multi_reduction <maximumf>, %96, %cst_39 [1] : vector<8x16xf32> to vector<8xf32>
    %98 = vector.shape_cast %97 : vector<8xf32> to vector<8x1xf32>
    %99 = vector.broadcast %98 : vector<8x1xf32> to vector<8x16xf32>
    %100 = arith.subf %96, %99 : vector<8x16xf32>
    %101 = math.exp %100 : vector<8x16xf32>
    %cst_40 = arith.constant dense<0.000000e+00> : vector<8xf32>
    %102 = vector.multi_reduction <add>, %101, %cst_40 [1] : vector<8x16xf32> to vector<8xf32>
    %103 = vector.shape_cast %102 : vector<8xf32> to vector<8x1xf32>
    %104 = tpu.reciprocal %103 : vector<8x1xf32> -> vector<8x1xf32>
    %105 = vector.broadcast %104 : vector<8x1xf32> to vector<8x16xf32>
    %106 = arith.mulf %101, %105 : vector<8x16xf32>
    %107 = vector.extract_strided_slice %91 {offsets = [0, 0], sizes = [16, 8], strides = [1, 1]} : vector<16x32xf32> to vector<16x8xf32>
    %cst_41 = arith.constant dense<0.000000e+00> : vector<8x8xf32>
    %108 = tpu.matmul %106, %107, %cst_41 {dimension_numbers = #tpu.dot_dimension_numbers<[1], [0], [0], [1], [0, 0, 1, 1], [], []>} : vector<8x16xf32>, vector<16x8xf32>, vector<8x8xf32> -> vector<8x8xf32>
    %109 = vector.extract_strided_slice %89 {offsets = [0, 8], sizes = [8, 8], strides = [1, 1]} : vector<8x32xf32> to vector<8x8xf32>
    %110 = vector.extract_strided_slice %90 {offsets = [0, 8], sizes = [16, 8], strides = [1, 1]} : vector<16x32xf32> to vector<16x8xf32>
    %cst_42 = arith.constant dense<0.000000e+00> : vector<8x16xf32>
    %111 = tpu.matmul %109, %110, %cst_42 {dimension_numbers = #tpu.dot_dimension_numbers<[1], [1], [0], [0], [0, 0, 1, 0], [], []>} : vector<8x8xf32>, vector<16x8xf32>, vector<8x16xf32> -> vector<8x16xf32>
    %cst_43 = arith.constant 0.353553385 : f32
    %112 = vector.broadcast %cst_43 : f32 to vector<8x16xf32>
    %113 = arith.mulf %111, %112 : vector<8x16xf32>
    %cst_44 = arith.constant dense<0xFF800000> : vector<8xf32>
    %114 = vector.multi_reduction <maximumf>, %113, %cst_44 [1] : vector<8x16xf32> to vector<8xf32>
    %115 = vector.shape_cast %114 : vector<8xf32> to vector<8x1xf32>
    %116 = vector.broadcast %115 : vector<8x1xf32> to vector<8x16xf32>
    %117 = arith.subf %113, %116 : vector<8x16xf32>
    %118 = math.exp %117 : vector<8x16xf32>
    %cst_45 = arith.constant dense<0.000000e+00> : vector<8xf32>
    %119 = vector.multi_reduction <add>, %118, %cst_45 [1] : vector<8x16xf32> to vector<8xf32>
    %120 = vector.shape_cast %119 : vector<8xf32> to vector<8x1xf32>
    %121 = tpu.reciprocal %120 : vector<8x1xf32> -> vector<8x1xf32>
    %122 = vector.broadcast %121 : vector<8x1xf32> to vector<8x16xf32>
    %123 = arith.mulf %118, %122 : vector<8x16xf32>
    %124 = vector.extract_strided_slice %91 {offsets = [0, 8], sizes = [16, 8], strides = [1, 1]} : vector<16x32xf32> to vector<16x8xf32>
    %cst_46 = arith.constant dense<0.000000e+00> : vector<8x8xf32>
    %125 = tpu.matmul %123, %124, %cst_46 {dimension_numbers = #tpu.dot_dimension_numbers<[1], [0], [0], [1], [0, 0, 1, 1], [], []>} : vector<8x16xf32>, vector<16x8xf32>, vector<8x8xf32> -> vector<8x8xf32>
    %126 = vector.extract_strided_slice %89 {offsets = [0, 16], sizes = [8, 8], strides = [1, 1]} : vector<8x32xf32> to vector<8x8xf32>
    %127 = vector.extract_strided_slice %90 {offsets = [0, 16], sizes = [16, 8], strides = [1, 1]} : vector<16x32xf32> to vector<16x8xf32>
    %cst_47 = arith.constant dense<0.000000e+00> : vector<8x16xf32>
    %128 = tpu.matmul %126, %127, %cst_47 {dimension_numbers = #tpu.dot_dimension_numbers<[1], [1], [0], [0], [0, 0, 1, 0], [], []>} : vector<8x8xf32>, vector<16x8xf32>, vector<8x16xf32> -> vector<8x16xf32>
    %cst_48 = arith.constant 0.353553385 : f32
    %129 = vector.broadcast %cst_48 : f32 to vector<8x16xf32>
    %130 = arith.mulf %128, %129 : vector<8x16xf32>
    %cst_49 = arith.constant dense<0xFF800000> : vector<8xf32>
    %131 = vector.multi_reduction <maximumf>, %130, %cst_49 [1] : vector<8x16xf32> to vector<8xf32>
    %132 = vector.shape_cast %131 : vector<8xf32> to vector<8x1xf32>
    %133 = vector.broadcast %132 : vector<8x1xf32> to vector<8x16xf32>
    %134 = arith.subf %130, %133 : vector<8x16xf32>
    %135 = math.exp %134 : vector<8x16xf32>
    %cst_50 = arith.constant dense<0.000000e+00> : vector<8xf32>
    %136 = vector.multi_reduction <add>, %135, %cst_50 [1] : vector<8x16xf32> to vector<8xf32>
    %137 = vector.shape_cast %136 : vector<8xf32> to vector<8x1xf32>
    %138 = tpu.reciprocal %137 : vector<8x1xf32> -> vector<8x1xf32>
    %139 = vector.broadcast %138 : vector<8x1xf32> to vector<8x16xf32>
    %140 = arith.mulf %135, %139 : vector<8x16xf32>
    %141 = vector.extract_strided_slice %91 {offsets = [0, 16], sizes = [16, 8], strides = [1, 1]} : vector<16x32xf32> to vector<16x8xf32>
    %cst_51 = arith.constant dense<0.000000e+00> : vector<8x8xf32>
    %142 = tpu.matmul %140, %141, %cst_51 {dimension_numbers = #tpu.dot_dimension_numbers<[1], [0], [0], [1], [0, 0, 1, 1], [], []>} : vector<8x16xf32>, vector<16x8xf32>, vector<8x8xf32> -> vector<8x8xf32>
    %143 = vector.extract_strided_slice %89 {offsets = [0, 24], sizes = [8, 8], strides = [1, 1]} : vector<8x32xf32> to vector<8x8xf32>
    %144 = vector.extract_strided_slice %90 {offsets = [0, 24], sizes = [16, 8], strides = [1, 1]} : vector<16x32xf32> to vector<16x8xf32>
    %cst_52 = arith.constant dense<0.000000e+00> : vector<8x16xf32>
    %145 = tpu.matmul %143, %144, %cst_52 {dimension_numbers = #tpu.dot_dimension_numbers<[1], [1], [0], [0], [0, 0, 1, 0], [], []>} : vector<8x8xf32>, vector<16x8xf32>, vector<8x16xf32> -> vector<8x16xf32>
    %cst_53 = arith.constant 0.353553385 : f32
    %146 = vector.broadcast %cst_53 : f32 to vector<8x16xf32>
    %147 = arith.mulf %145, %146 : vector<8x16xf32>
    %cst_54 = arith.constant dense<0xFF800000> : vector<8xf32>
    %148 = vector.multi_reduction <maximumf>, %147, %cst_54 [1] : vector<8x16xf32> to vector<8xf32>
    %149 = vector.shape_cast %148 : vector<8xf32> to vector<8x1xf32>
    %150 = vector.broadcast %149 : vector<8x1xf32> to vector<8x16xf32>
    %151 = arith.subf %147, %150 : vector<8x16xf32>
    %152 = math.exp %151 : vector<8x16xf32>
    %cst_55 = arith.constant dense<0.000000e+00> : vector<8xf32>
    %153 = vector.multi_reduction <add>, %152, %cst_55 [1] : vector<8x16xf32> to vector<8xf32>
    %154 = vector.shape_cast %153 : vector<8xf32> to vector<8x1xf32>
    %155 = tpu.reciprocal %154 : vector<8x1xf32> -> vector<8x1xf32>
    %156 = vector.broadcast %155 : vector<8x1xf32> to vector<8x16xf32>
    %157 = arith.mulf %152, %156 : vector<8x16xf32>
    %158 = vector.extract_strided_slice %91 {offsets = [0, 24], sizes = [16, 8], strides = [1, 1]} : vector<16x32xf32> to vector<16x8xf32>
    %cst_56 = arith.constant dense<0.000000e+00> : vector<8x8xf32>
    %159 = tpu.matmul %157, %158, %cst_56 {dimension_numbers = #tpu.dot_dimension_numbers<[1], [0], [0], [1], [0, 0, 1, 1], [], []>} : vector<8x16xf32>, vector<16x8xf32>, vector<8x8xf32> -> vector<8x8xf32>
    %160 = tpu.concatenate %108, %125, %142, %159 in 1 : vector<8x8xf32>, vector<8x8xf32>, vector<8x8xf32>, vector<8x8xf32> -> vector<8x32xf32>
    %161 = tpu.concatenate %88, %160 in 0 : vector<8x32xf32>, vector<8x32xf32> -> vector<16x32xf32>
    %c0_57 = arith.constant 0 : index
    %c0_58 = arith.constant 0 : index
    %162 = vector.load %arg9[%c0_57, %c0_58] : memref<32x32xf32, #tpu.memory_space<vmem>>, vector<32x32xf32>
    %cst_59 = arith.constant dense<0.000000e+00> : vector<16x32xf32>
    %163 = tpu.matmul %161, %162, %cst_59 {dimension_numbers = #tpu.dot_dimension_numbers<[1], [0], [0], [1], [0, 0, 1, 1], [], []>} : vector<16x32xf32>, vector<32x32xf32>, vector<16x32xf32> -> vector<16x32xf32>
    %c0_60 = arith.constant 0 : index
    %c0_61 = arith.constant 0 : index
    %164 = vector.load %arg10[%c0_60, %c0_61] : memref<1x32xf32, #tpu.memory_space<vmem>>, vector<1x32xf32>
    %165 = vector.broadcast %164 : vector<1x32xf32> to vector<16x32xf32>
    %166 = arith.addf %163, %165 : vector<16x32xf32>
    %c0_62 = arith.constant 0 : index
    %c0_63 = arith.constant 0 : index
    %167 = vector.load %arg11[%c0_62, %c0_63] : memref<16x32xf32, #tpu.memory_space<vmem>>, vector<16x32xf32>
    tpu.vector_store %arg11[%c0_62, %c0_63], %166 {strides = array<i32>} : memref<16x32xf32, #tpu.memory_space<vmem>>, vector<16x32xf32>,
    return
  }
  func.func @transform_0(%arg0: i32) -> (i32, i32) {
    %c0_i32 = arith.constant 0 : i32
    %c0_i32_0 = arith.constant 0 : i32
    return %arg0, %c0_i32 : i32, i32
  }
  func.func @transform_1(%arg0: i32) -> (i32, i32) {
    %c0_i32 = arith.constant 0 : i32
    %c0_i32_0 = arith.constant 0 : i32
    return %arg0, %c0_i32 : i32, i32
  }
  func.func @transform_2(%arg0: i32) -> (i32, i32) {
    %c0_i32 = arith.constant 0 : i32
    %c0_i32_0 = arith.constant 0 : i32
    %c0_i32_1 = arith.constant 0 : i32
    return %c0_i32, %c0_i32_0 : i32, i32
  }
  func.func @transform_3(%arg0: i32) -> (i32, i32) {
    %c0_i32 = arith.constant 0 : i32
    %c0_i32_0 = arith.constant 0 : i32
    %c0_i32_1 = arith.constant 0 : i32
    return %c0_i32, %c0_i32_0 : i32, i32
  }
  func.func @transform_4(%arg0: i32) -> (i32, i32) {
    %c0_i32 = arith.constant 0 : i32
    %c0_i32_0 = arith.constant 0 : i32
    %c0_i32_1 = arith.constant 0 : i32
    return %c0_i32, %c0_i32_0 : i32, i32
  }
  func.func @transform_5(%arg0: i32) -> (i32, i32) {
    %c0_i32 = arith.constant 0 : i32
    %c0_i32_0 = arith.constant 0 : i32
    %c0_i32_1 = arith.constant 0 : i32
    return %c0_i32, %c0_i32_0 : i32, i32
  }
  func.func @transform_6(%arg0: i32) -> (i32, i32) {
    %c0_i32 = arith.constant 0 : i32
    %c0_i32_0 = arith.constant 0 : i32
    %c0_i32_1 = arith.constant 0 : i32
    return %c0_i32, %c0_i32_0 : i32, i32
  }
  func.func @transform_7(%arg0: i32) -> (i32, i32) {
    %c0_i32 = arith.constant 0 : i32
    %c0_i32_0 = arith.constant 0 : i32
    %c0_i32_1 = arith.constant 0 : i32
    return %c0_i32, %c0_i32_0 : i32, i32
  }
  func.func @transform_8(%arg0: i32) -> (i32, i32) {
    %c0_i32 = arith.constant 0 : i32
    %c0_i32_0 = arith.constant 0 : i32
    %c0_i32_1 = arith.constant 0 : i32
    return %c0_i32, %c0_i32_0 : i32, i32
  }
  func.func @transform_9(%arg0: i32) -> (i32, i32) {
    %c0_i32 = arith.constant 0 : i32
    %c0_i32_0 = arith.constant 0 : i32
    %c0_i32_1 = arith.constant 0 : i32
    return %c0_i32, %c0_i32_0 : i32, i32
  }
  func.func @transform_10(%arg0: i32) -> (i32, i32) {
    %c0_i32 = arith.constant 0 : i32
    %c0_i32_0 = arith.constant 0 : i32
    return %arg0, %c0_i32 : i32, i32
  }
}

</mosaic_0001>

<bundles_post_ra>
// kernel: tpu_custom_call.1
= control target key start
LH: loop header
LB: loop body
LE: loop exit
PB: predicated region body
PF: predicated region fallthrough
CT: control target
= control target key end

     0   :  { %vm50_vm0 = vcmask 261120   ;;  %s1400_s0 = inlined_call_operand.vmem [shape: f32[16,32], index: 0, kind: input, shape index: {}]   ;;  %s1401_s1 = inlined_call_operand.vmem [shape: f32[32,64], index: 1, kind: input, shape index: {}]   ;;  %s1402_s2 = inlined_call_operand.vmem [shape: f32[32,32], index: 2, kind: input, shape index: {}]   ;;  %s1403_s3 = inlined_call_operand.vmem [shape: f32[1,32], index: 3, kind: input, shape index: {}]   ;;  %s1404_s4 = inlined_call_operand.vmem [shape: f32[64,32], index: 4, kind: input, shape index: {}]   ;;  %s1405_s5 = inlined_call_operand.vmem [shape: f32[1,32], index: 5, kind: input, shape index: {}]   ;;  %s1406_s6 = inlined_call_operand.vmem [shape: f32[64,32], index: 6, kind: input, shape index: {}]   ;;  %s1407_s7 = inlined_call_operand.vmem [shape: f32[1,32], index: 7, kind: input, shape index: {}]   ;;  %s1408_s8 = inlined_call_operand.vmem [shape: f32[32,32], index: 8, kind: input, shape index: {}]   ;;  %s1409_s9 = inlined_call_operand.vmem [shape: f32[1,32], index: 9, kind: input, shape index: {}]   ;;  %s1410_s10 = inlined_call_operand.hbm [shape: f32[16,32], index: 10, kind: output, shape index: {}]  }
   0x1   :  { %v45_v0 = vld [vmem:[%s1402_s2 + $0x18] sm:$0xff]  ;;  %v44_v1 = vld [vmem:[%s1402_s2 + $0x10] sm:$0xff]  ;;  %v43_v2 = vld [vmem:[%s1402_s2 + $0x8] sm:$0xff] }
   0x2   :  { %69 = vmatpush.msra.mxu1 %v45_v0  ;;  %v42_v3 = vld [vmem:[%s1402_s2] sm:$0xff]  ;;  %v87_v5 = vld [vmem:[%s1404_s4 + $0x38] sm:$0xff] }
   0x3   :  { %v36_v4 = vld [vmem:[%s1400_s0] sm:$0xff] }
   0x4   :  { %70 = vmatpush.msra.mxu1 %v44_v1 }
   0x6   :  { %71 = vmatpush.msra.mxu1 %v43_v2 }
   0x8   :  { %72 = vmatpush.msra.mxu1 %v42_v3 }
   0x9   :  { %15 = vsyncpa [#allocation3], 0  ;;  %939 = vmatmul.msk.f32.vlgmr.msra.gmra.mxu1 %vm50_vm0, %v36_v4  ;;  %v86_v6 = vld [vmem:[%s1404_s4 + $0x30] sm:$0xff]  ;;  %v85_v7 = vld [vmem:[%s1404_s4 + $0x28] sm:$0xff]  ;;  %vm92_vm1 = vcmask 523264   ;;  %s1083_s27 = smov 120  }
   0xa   :  { %113 = vmatpush.msrb.mxu1 %v87_v5  ;;  %v84_v8 = vld [vmem:[%s1404_s4 + $0x20] sm:$0xff]  ;;  %v37_v9 = vld [vmem:[%s1400_s0 + $0x8] sm:$0xff]  ;;  %v83_v10 = vld [vmem:[%s1404_s4 + $0x18] sm:$0xff]  ;;  %s1084_s30 = smov 112   ;;  %vm175_vm2 = vcmask 64512   ;;  %vm206_vm3 = vcmask 130048  }
   0xb   :  { %v82_v11 = vld [vmem:[%s1404_s4 + $0x10] sm:$0xff]  ;;  %v81_v12 = vld [vmem:[%s1404_s4 + $0x8] sm:$0xff]  ;;  %v80_v13 = vld [vmem:[%s1404_s4] sm:$0xff]  ;;  %s1087_s4 = smov 16   ;;  %s1088_s25 = smov 24  }
   0xc   :  { %114 = vmatpush.msrb.mxu1 %v86_v6  ;;  %v1193_v14 = vld [vmem:[%s1401_s1] sm:$0xff]  ;;  %v39_v15 = vld [vmem:[%s1401_s1 + $0x8] sm:$0xff]  ;;  %v40_v16 = vld [vmem:[%s1401_s1 + $0x10] sm:$0xff]  ;;  %s927_s13 = sshll.u32 %s1410_s10, 4  ;;  %s1089_s14 = smov [#allocation2]   ;;  %s928_s13 = int_to_ptr.hbm [resolvable:$true] %s927_s13 }
   0xd   :  { %v41_v17 = vld [vmem:[%s1401_s1 + $0x18] sm:$0xff]  ;;  %v1021_v18 = vld [vmem:[%s1403_s3] ss:$0 sm:$0xff]  ;;  %s1085_s1 = smov 104   ;;  %v140_v33 = vld [vmem:[%s1406_s6 + $0x30] sm:$0xff]  ;;  %s925_s15 = sshll.u32 %s1089_s14, 4  ;;  %s926_s15 = int_to_ptr.vmem [resolvable:$true] %s925_s15 }
   0xe   :  { %115 = vmatpush.msrb.mxu1 %v85_v7  ;;  %v1022_v22 = vld [vmem:[%s1405_s5] ss:$0 sm:$0xff]  ;;  %v141_v32 = vld [vmem:[%s1406_s6 + $0x38] sm:$0xff]  ;;  %v139_v34 = vld [vmem:[%s1406_s6 + $0x28] sm:$0xff]  ;;  %s1090_s16 = smov 128  }
   0xf   :  { %154 = vmatpush.msra.mxu2 %v141_v32  ;;  %v138_v35 = vld [vmem:[%s1406_s6 + $0x20] sm:$0xff]  ;;  %v137_v36 = vld [vmem:[%s1406_s6 + $0x18] sm:$0xff]  ;;  %v136_v37 = vld [vmem:[%s1406_s6 + $0x10] sm:$0xff] }
  0x10   :  { %116 = vmatpush.msrb.mxu1 %v84_v8  ;;  %v135_v38 = vld [vmem:[%s1406_s6 + $0x8] sm:$0xff]  ;;  %v134_v39 = vld [vmem:[%s1406_s6] sm:$0xff] }
  0x11   :  { %940 = vmatmul.msk.f32.gmra.mxu1 %vm50_vm0, %v37_v9  ;;  %155 = vmatpush.msra.mxu2 %v140_v33  ;;  %v1023_v62 = vld [vmem:[%s1407_s7] ss:$0 sm:$0xff]  ;;  %s1086_s7 = smov 8  }
  0x12   :  { %117 = vmatpush.msrb.mxu1 %v83_v10 }
  0x13   :  { %156 = vmatpush.msra.mxu2 %v139_v34 }
  0x14   :  { %118 = vmatpush.msrb.mxu1 %v82_v11 }
  0x15   :  { %157 = vmatpush.msra.mxu2 %v138_v35 }
  0x16   :  { %119 = vmatpush.msrb.mxu1 %v81_v12 }
  0x17   :  { %158 = vmatpush.msra.mxu2 %v137_v36 }
  0x18   :  { %120 = vmatpush.msrb.mxu1 %v80_v13 }
  0x19   :  { %941 = vmatmul.msk.f32.vlgmr.msrb.gmra.mxu1 %vm92_vm1, %v1193_v14  ;;  %159 = vmatpush.msra.mxu2 %v136_v37 }
  0x1b   :  { %160 = vmatpush.msra.mxu2 %v135_v38 }
  0x1d   :  { %161 = vmatpush.msra.mxu2 %v134_v39 }
  0x1e   :  { %945 = vmatmul.msk.f32.vlgmr.msra.gmra.mxu2 %vm92_vm1, %v1193_v14 }
  0x21   :  { %942 = vmatmul.msk.f32.gmra.mxu1 %vm92_vm1, %v39_v15 }
  0x26   :  { %946 = vmatmul.msk.f32.gmra.mxu2 %vm92_vm1, %v39_v15 }
  0x29   :  { %943 = vmatmul.msk.f32.gmra.mxu1 %vm92_vm1, %v40_v16 }
  0x2e   :  { %947 = vmatmul.msk.f32.gmra.mxu2 %vm92_vm1, %v40_v16 }
  0x31   :  { %944 = vmatmul.msk.f32.gmra.mxu1 %vm92_vm1, %v41_v17 }
  0x36   :  { %948 = vmatmul.msk.f32.gmra.mxu2 %vm92_vm1, %v41_v17 }
  0x86   :  { %v74_v19 = vpop.f32.mrf.mxu1 }
  0x87   :  { %v75_v20 = vadd.f32 %v1021_v18, %v74_v19 }
  0x89   :  { %254 = vrot.lane.b32.xlu1 %v75_v20, %s1083_s27 }
  0x8e   :  { %v77_v21 = vpop.f32.mrf.mxu1 }
  0x8f   :  { %v1225_v30 = vadd.f32 %v1021_v18, %v77_v21 }
  0x96   :  { %v122_v23 = vpop.f32.mrf.mxu1 }
  0x97   :  { %v123_v24 = vadd.f32 %v1022_v22, %v122_v23 }
  0x99   :  { %344 = vrot.lane.b32.xlu2 %v123_v24, %s1084_s30 }
  0x9e   :  { %v125_v25 = vpop.f32.mrf.mxu1 }
  0x9f   :  { %v126_v26 = vadd.f32 %v1022_v22, %v125_v25 }
  0xa1   :  { %258 = vrot.lane.b32.xlu0 %v126_v26, %s1083_s27  ;;  %949 = vmatpush.xpose.msk.msra.mxu3 %vm175_vm2, %v126_v26  ;;  %v163_v61 = vpop.f32.mrf.mxu2 }
  0xa2   :  { %342 = vrot.lane.b32.xlu2 %v75_v20, %s1084_s30  ;;  %346 = vrot.lane.b32.xlu1 %v126_v26, %s1084_s30  ;;  %v164_v0 = vadd.f32 %v1023_v62, %v163_v61 }
  0xa5   :  { %950 = vmatpush.xpose.msk.msra.mxu3 %vm175_vm2, %v123_v24 }
  0xa6   :  { %v128_v27 = vpop.f32.mrf.mxu1 }
  0xa7   :  { %v129_v31 = vadd.f32 %v1022_v22, %v128_v27 }
  0xa8   :  { %951 = vmatmul.msk.f32.vlgmr.msra.gmra.mxu3 %vm175_vm2, %v75_v20 }
  0xa9   :  { %256 = vrot.lane.b32.xlu0 %v123_v24, %s1083_s27  ;;  %v166_v63 = vpop.f32.mrf.mxu2 }
  0xaa   :  { %430 = vrot.lane.b32.xlu2 %v123_v24, %s1085_s1  ;;  %v167_v1 = vadd.f32 %v1023_v62, %v166_v63 }
  0xac   :  { %248 = vmatpush.msrb.mxu3 %v167_v1  ;;  %v1296_v2 = vpack.i.bf16 %v164_v0, %v167_v1 }
  0xae   :  { %v131_v28 = vpop.f32.mrf.mxu1  ;;  %249 = vmatpush.msrb.mxu3 %v164_v0 }
  0xaf   :  { %v132_v29 = vadd.f32 %v1022_v22, %v131_v28 }
  0xb1   :  { %432 = vrot.lane.b32.xlu0 %v126_v26, %s1085_s1  ;;  %611 = vrot.lane.b32.xlu1 %v132_v29, %s1083_s27  ;;  %v169_v3 = vpop.f32.mrf.mxu2 }
  0xb2   :  { %607 = vrot.lane.b32.xlu2 %v1225_v30, %s1083_s27  ;;  %v170_v5 = vadd.f32 %v1023_v62, %v169_v3 }
  0xb9   :  { %609 = vrot.lane.b32.xlu0 %v129_v31, %s1083_s27  ;;  %428 = vrot.lane.b32.xlu1 %v75_v20, %s1085_s1  ;;  %v172_v4 = vpop.f32.mrf.mxu2 }
  0xba   :  { %781 = vrot.lane.b32.xlu2 %v1225_v30, %s1085_s1  ;;  %v173_v6 = vadd.f32 %v1023_v62, %v172_v4 }
  0xbc   :  { %601 = vmatpush.msra.mxu1 %v173_v6  ;;  %v1298_v7 = vpack.i.bf16 %v170_v5, %v173_v6 }
  0xbe   :  { %602 = vmatpush.msra.mxu1 %v170_v5 }
  0xc1   :  { %785 = vrot.lane.b32.xlu0 %v132_v29, %s1085_s1  ;;  %783 = vrot.lane.b32.xlu1 %v129_v31, %s1085_s1 }
  0xc2   :  { %695 = vrot.lane.b32.xlu2 %v1225_v30, %s1084_s30 }
  0xc9   :  { %699 = vrot.lane.b32.xlu0 %v132_v29, %s1084_s30  ;;  %697 = vrot.lane.b32.xlu1 %v129_v31, %s1084_s30 }
  0xf3   :  { %v345_v40 = vpop.permute.xlu2 %344 }
  0xfb   :  { %v255_v41 = vpop.permute.xlu1 %254 }
  0xfc   :  { %v343_v43 = vpop.permute.xlu2 %342 }
 0x104   :  { %v431_v48 = vpop.permute.xlu2 %430 }
 0x10c   :  { %v608_v53 = vpop.permute.xlu2 %607 }
 0x113   :  { %v259_v42 = vpop.permute.xlu0 %258 }
 0x114   :  { %953 = vmatpush.xpose.msk.msra.mxu0 %vm175_vm2, %v259_v42  ;;  %v347_v44 = vpop.permute.xlu1 %346  ;;  %v782_v57 = vpop.permute.xlu2 %781 }
 0x11b   :  { %v257_v45 = vpop.permute.xlu0 %256 }
 0x11c   :  { %954 = vmatpush.xpose.msk.msra.mxu0 %vm175_vm2, %v257_v45  ;;  %v696_v60 = vpop.permute.xlu2 %695 }
 0x11f   :  { %955 = vmatmul.msk.f32.vlgmr.msra.gmra.mxu0 %vm175_vm2, %v255_v41 }
 0x120   :  { %957 = vmatpush.xpose.msk.msrb.mxu0 %vm175_vm2, %v347_v44 }
 0x123   :  { %v433_v46 = vpop.permute.xlu0 %432  ;;  %v612_v47 = vpop.permute.xlu1 %611 }
 0x124   :  { %958 = vmatpush.xpose.msk.msrb.mxu0 %vm175_vm2, %v345_v40  ;;  %969 = vmatpush.xpose.msk.msrb.mxu2 %vm175_vm2, %v612_v47 }
 0x127   :  { %959 = vmatmul.msk.f32.vlgmr.msrb.gmra.mxu0 %vm175_vm2, %v343_v43 }
 0x128   :  { %961 = vmatpush.xpose.msk.msra.mxu0 %vm175_vm2, %v433_v46 }
 0x12b   :  { %v610_v49 = vpop.permute.xlu0 %609  ;;  %v429_v50 = vpop.permute.xlu1 %428 }
 0x12c   :  { %962 = vmatpush.xpose.msk.msra.mxu0 %vm175_vm2, %v431_v48  ;;  %v202_v51 = vpop.f32.mrf.mxu3  ;;  %970 = vmatpush.xpose.msk.msrb.mxu2 %vm175_vm2, %v610_v49 }
 0x12d   :  { %v205_v52 = vmul.f32 0.35355338, %v202_v51 }
 0x12f   :  { %963 = vmatmul.msk.f32.vlgmr.msra.gmra.mxu0 %vm175_vm2, %v429_v50  ;;  %971 = vmatmul.msk.f32.vlgmr.msrb.gmra.mxu2 %vm175_vm2, %v608_v53  ;;  %v207_v54 = vsel %vm206_vm3, %v205_v52, -inf }
 0x130   :  { %965 = vmatpush.xpose.msk.msrb.mxu0 %vm175_vm2, %v132_v29  ;;  %208 = vmax.xlane.f32.xlu0 %v207_v54 }
 0x133   :  { %v786_v55 = vpop.permute.xlu0 %785  ;;  %v784_v56 = vpop.permute.xlu1 %783 }
 0x134   :  { %966 = vmatpush.xpose.msk.msrb.mxu0 %vm175_vm2, %v129_v31  ;;  %977 = vmatpush.xpose.msk.msra.mxu2 %vm175_vm2, %v786_v55 }
 0x137   :  { %967 = vmatmul.msk.f32.vlgmr.msrb.gmra.mxu0 %vm175_vm2, %v1225_v30 }
 0x138   :  { %978 = vmatpush.xpose.msk.msra.mxu2 %vm175_vm2, %v784_v56 }
 0x13b   :  { %v700_v58 = vpop.permute.xlu0 %699  ;;  %979 = vmatmul.msk.f32.vlgmr.msra.gmra.mxu2 %vm175_vm2, %v782_v57  ;;  %v698_v59 = vpop.permute.xlu1 %697 }
 0x13c   :  { %973 = vmatpush.xpose.msk.msra.mxu0 %vm175_vm2, %v700_v58 }
 0x140   :  { %974 = vmatpush.xpose.msk.msra.mxu0 %vm175_vm2, %v698_v59 }
 0x143   :  { %975 = vmatmul.msk.f32.vlgmr.msra.gmra.mxu0 %vm175_vm2, %v696_v60 }
 0x19c   :  { %v283_v8 = vpop.f32.mrf.mxu0 }
 0x19d   :  { %v286_v9 = vmul.f32 0.35355338, %v283_v8 }
 0x19f   :  { %v287_v10 = vsel %vm206_vm3, %v286_v9, -inf }
 0x1a0   :  { %288 = vmax.xlane.f32.xlu1 %v287_v10 }
 0x1a3   :  { %v209_v11 = vpop.xlane.xlu0 %208 }
 0x1a4   :  { %v210_v12 = vsub.f32 %v205_v52, %v209_v11  ;;  %v371_v13 = vpop.f32.mrf.mxu0 }
 0x1a5   :  { %v374_v14 = vmul.f32 0.35355338, %v371_v13 }
 0x1a6   :  { %v211_v15 = vmul.f32 1.442695, %v210_v12 }
 0x1a7   :  { %v375_v16 = vsel %vm206_vm3, %v374_v14, -inf }
 0x1a8   :  { %1025 = vpow2.f32 %v211_v15  ;;  %376 = vmax.xlane.f32.xlu2 %v375_v16 }
 0x1ac   :  { %v457_v17 = vpop.f32.mrf.mxu0 }
 0x1ad   :  { %v460_v18 = vmul.f32 0.35355338, %v457_v17 }
 0x1ae   :  { %v1302_v19 = vpop.eup %1025 }
 0x1af   :  { %v213_v20 = vsel %vm206_vm3, %v1302_v19, 0.0  ;;  %v461_v21 = vsel %vm206_vm3, %v460_v18, -inf }
 0x1b0   :  { %214 = vadd.xlane.f32.xlu1 %v213_v20  ;;  %462 = vmax.xlane.f32.xlu2 %v461_v21 }
 0x1b2   :  { %v636_v22 = vpop.f32.mrf.mxu2 }
 0x1b3   :  { %v639_v23 = vmul.f32 0.35355338, %v636_v22 }
 0x1b4   :  { %v556_v24 = vpop.f32.mrf.mxu0 }
 0x1b5   :  { %v559_v25 = vmul.f32 0.35355338, %v556_v24  ;;  %v640_v26 = vsel %vm206_vm3, %v639_v23, -inf }
 0x1b6   :  { %641 = vmax.xlane.f32.xlu0 %v640_v26 }
 0x1b7   :  { %v560_v27 = vsel %vm206_vm3, %v559_v25, -inf }
 0x1b8   :  { %561 = vmax.xlane.f32.xlu1 %v560_v27 }
 0x1be   :  { %v810_v28 = vpop.f32.mrf.mxu2 }
 0x1bf   :  { %v813_v29 = vmul.f32 0.35355338, %v810_v28 }
 0x1c0   :  { %v724_v30 = vpop.f32.mrf.mxu0 }
 0x1c1   :  { %v1309_v31 = vmul.f32 0.35355338, %v724_v30  ;;  %v814_v32 = vsel %vm206_vm3, %v813_v29, -inf }
 0x1c2   :  { %815 = vmax.xlane.f32.xlu2 %v814_v32 }
 0x1c3   :  { %v728_v33 = vsel %vm206_vm3, %v1309_v31, -inf }
 0x1c4   :  { %729 = vmax.xlane.f32.xlu0 %v728_v33 }
 0x1d1   :  { %997 = vrot.lane.b32.xlu1 %v1296_v2, %s1084_s30 }
 0x1da   :  { %992 = vrot.lane.b32.xlu2 %v1296_v2, %s1083_s27 }
 0x213   :  { %v289_v34 = vpop.xlane.xlu1 %288 }
 0x214   :  { %v290_v35 = vsub.f32 %v286_v9, %v289_v34 }
 0x216   :  { %v291_v36 = vmul.f32 1.442695, %v290_v35 }
 0x218   :  { %1027 = vpow2.f32 %v291_v36 }
 0x21b   :  { %v377_v37 = vpop.xlane.xlu2 %376 }
 0x21c   :  { %v378_v38 = vsub.f32 %v374_v14, %v377_v37 }
 0x21e   :  { %v1318_v39 = vpop.eup %1027  ;;  %v379_v40 = vmul.f32 1.442695, %v378_v38 }
 0x21f   :  { %v293_v41 = vsel %vm206_vm3, %v1318_v39, 0.0 }
 0x220   :  { %1029 = vpow2.f32 %v379_v40  ;;  %294 = vadd.xlane.f32.xlu2 %v293_v41 }
 0x223   :  { %v215_v42 = vpop.xlane.xlu1 %214  ;;  %v463_v43 = vpop.xlane.xlu2 %462 }
 0x224   :  { %1031 = vrcp.f32 %v215_v42  ;;  %v464_v44 = vsub.f32 %v460_v18, %v463_v43  ;;  %v227_v56 = vand.u32 2147483648, %v215_v42  ;;  %v225_v59 = vand.u32 2147483647, %v215_v42 }
 0x225   :  { %vm221_vm5 = vweird.f32 %v215_v42 }
 0x226   :  { %v1322_v45 = vpop.eup %1029  ;;  %v465_v46 = vmul.f32 1.442695, %v464_v44  ;;  %v228_v63 = vor.u32 1.1754944e-38, %v227_v56  ;;  %vm226_vm7 = vcmp.eq.f32.partialorder %v225_v59, 8.507059e+37 }
 0x227   :  { %v381_v47 = vsel %vm206_vm3, %v1322_v45, 0.0 }
 0x228   :  { %382 = vadd.xlane.f32.xlu0 %v381_v47  ;;  %1033 = vpow2.f32 %v465_v46 }
 0x229   :  { %v642_v48 = vpop.xlane.xlu0 %641 }
 0x22a   :  { %v1032_v49 = vpop.eup %1031  ;;  %v643_v50 = vsub.f32 %v639_v23, %v642_v48 }
 0x22b   :  { %v217_v51 = vmul.f32 %v1032_v49, %v215_v42  ;;  %v562_v52 = vpop.xlane.xlu1 %561  ;;  %vm222_vm4 = vweird.f32 %v1032_v49 }
 0x22c   :  { %v644_v53 = vmul.f32 1.442695, %v643_v50  ;;  %v563_v54 = vsub.f32 %v559_v25, %v562_v52  ;;  %vm223_vm6 = vmor %vm221_vm5, %vm222_vm4 }
 0x22d   :  { %v218_v55 = vsub.f32 1.0, %v217_v51 }
 0x22e   :  { %1035 = vpow2.f32 %v644_v53  ;;  %v1326_v57 = vpop.eup %1033  ;;  %v564_v60 = vmul.f32 1.442695, %v563_v54 }
 0x22f   :  { %v219_v58 = vmul.f32 %v1032_v49, %v218_v55  ;;  %v467_v61 = vsel %vm206_vm3, %v1326_v57, 0.0 }
 0x230   :  { %468 = vadd.xlane.f32.xlu1 %v467_v61  ;;  %1037 = vpow2.f32 %v564_v60 }
 0x231   :  { %v220_v62 = vadd.f32 %v1032_v49, %v219_v58 }
 0x233   :  { %v224_v0 = vsel %vm223_vm6, %v1032_v49, %v220_v62 }
 0x234   :  { %v1330_v1 = vpop.eup %1035  ;;  %v229_v3 = vsel %vm226_vm7, %v228_v63, %v224_v0 }
 0x235   :  { %v816_v4 = vpop.xlane.xlu2 %815  ;;  %v230_v5 = vmul.f32 %v1302_v19, %v229_v3  ;;  %v646_v6 = vsel %vm206_vm3, %v1330_v1, 0.0 }
 0x236   :  { %v817_v8 = vsub.f32 %v813_v29, %v816_v4  ;;  %647 = vadd.xlane.f32.xlu0 %v646_v6  ;;  %v1338_v11 = vpop.eup %1037 }
 0x237   :  { %952 = vmatmul.msk.f32.vlgmr.msrb.gmra.mxu3 %vm206_vm3, %v230_v5  ;;  %v730_v10 = vpop.xlane.xlu0 %729  ;;  %v566_v14 = vsel %vm206_vm3, %v1338_v11, 0.0 }
 0x238   :  { %v818_v9 = vmul.f32 1.442695, %v817_v8  ;;  %1002 = vrot.lane.b32.xlu2 %v1296_v2, %s1085_s1  ;;  %v731_v12 = vsub.f32 %v1309_v31, %v730_v10 }
 0x23a   :  { %1039 = vpow2.f32 %v818_v9  ;;  %v732_v16 = vmul.f32 1.442695, %v731_v12 }
 0x23c   :  { %1041 = vpow2.f32 %v732_v16 }
 0x23d   :  { %v993_v13 = vpop.permute.xlu2 %992 }
 0x23e   :  { %v994_v15 = vunpack.i.l.bf16 %v993_v13  ;;  %567 = vadd.xlane.f32.xlu0 %v566_v14  ;;  %v995_v17 = vunpack.i.h.bf16 %v993_v13 }
 0x240   :  { %1012 = vrot.lane.b32.xlu2 %v1298_v7, %s1085_s1  ;;  %336 = vmatpush.msra.mxu3 %v994_v15  ;;  %v1345_v18 = vpop.eup %1039 }
 0x241   :  { %v820_v20 = vsel %vm206_vm3, %v1345_v18, 0.0 }
 0x242   :  { %337 = vmatpush.msra.mxu3 %v995_v17  ;;  %v1349_v22 = vpop.eup %1041 }
 0x243   :  { %v998_v2 = vpop.permute.xlu1 %997  ;;  %v734_v23 = vsel %vm206_vm3, %v1349_v22, 0.0 }
 0x244   :  { %v999_v19 = vunpack.i.l.bf16 %v998_v2  ;;  %v1000_v21 = vunpack.i.h.bf16 %v998_v2 }
 0x246   :  { %422 = vmatpush.msrb.mxu3 %v999_v19  ;;  %821 = vadd.xlane.f32.xlu0 %v820_v20 }
 0x248   :  { %423 = vmatpush.msrb.mxu3 %v1000_v21 }
 0x249   :  { %1007 = vrot.lane.b32.xlu1 %v1298_v7, %s1083_s27 }
 0x24e   :  { %735 = vadd.xlane.f32.xlu0 %v734_v23 }
 0x262   :  { %1017 = vrot.lane.b32.xlu0 %v1298_v7, %s1084_s30 }
 0x293   :  { %v295_v24 = vpop.xlane.xlu2 %294 }
 0x294   :  { %1043 = vrcp.f32 %v295_v24  ;;  %v307_v29 = vand.u32 2147483648, %v295_v24  ;;  %v305_v31 = vand.u32 2147483647, %v295_v24  ;;  %vm301_vm9 = vweird.f32 %v295_v24 }
 0x296   :  { %v308_v34 = vor.u32 1.1754944e-38, %v307_v29  ;;  %vm306_vm11 = vcmp.eq.f32.partialorder %v305_v31, 8.507059e+37 }
 0x29a   :  { %v1044_v25 = vpop.eup %1043 }
 0x29b   :  { %v297_v26 = vmul.f32 %v1044_v25, %v295_v24  ;;  %v383_v27 = vpop.xlane.xlu0 %382  ;;  %vm302_vm8 = vweird.f32 %v1044_v25  ;;  %v1003_v37 = vpop.permute.xlu2 %1002 }
 0x29c   :  { %1045 = vrcp.f32 %v383_v27  ;;  %vm303_vm10 = vmor %vm301_vm9, %vm302_vm8  ;;  %v395_v41 = vand.u32 2147483648, %v383_v27  ;;  %v1004_v43 = vunpack.i.l.bf16 %v1003_v37  ;;  %v393_v46 = vand.u32 2147483647, %v383_v27 }
 0x29d   :  { %v298_v28 = vsub.f32 1.0, %v297_v26  ;;  %v1005_v47 = vunpack.i.h.bf16 %v1003_v37  ;;  %vm389_vm13 = vweird.f32 %v383_v27 }
 0x29e   :  { %v396_v50 = vor.u32 1.1754944e-38, %v395_v41  ;;  %vm394_vm15 = vcmp.eq.f32.partialorder %v393_v46, 8.507059e+37 }
 0x29f   :  { %v299_v30 = vmul.f32 %v1044_v25, %v298_v28 }
 0x2a1   :  { %v300_v32 = vadd.f32 %v1044_v25, %v299_v30 }
 0x2a2   :  { %v1046_v33 = vpop.eup %1045 }
 0x2a3   :  { %v304_v35 = vsel %vm303_vm10, %v1044_v25, %v300_v32  ;;  %v385_v36 = vmul.f32 %v1046_v33, %v383_v27  ;;  %v469_v38 = vpop.xlane.xlu1 %468  ;;  %vm390_vm12 = vweird.f32 %v1046_v33  ;;  %v1013_v24 = vpop.permute.xlu2 %1012 }
 0x2a4   :  { %v309_v7 = vsel %vm306_vm11, %v308_v34, %v304_v35  ;;  %1047 = vrcp.f32 %v469_v38  ;;  %vm391_vm14 = vmor %vm389_vm13, %vm390_vm12  ;;  %v481_v56 = vand.u32 2147483648, %v469_v38  ;;  %v479_v60 = vand.u32 2147483647, %v469_v38 }
 0x2a5   :  { %v386_v40 = vsub.f32 1.0, %v385_v36  ;;  %v310_v42 = vmul.f32 %v1318_v39, %v309_v7  ;;  %vm475_vm4 = vweird.f32 %v469_v38  ;;  %v1014_v30 = vunpack.i.l.bf16 %v1013_v24 }
 0x2a6   :  { %v482_v0 = vor.u32 1.1754944e-38, %v481_v56  ;;  %vm480_vm6 = vcmp.eq.f32.partialorder %v479_v60, 8.507059e+37  ;;  %v1015_v35 = vunpack.i.h.bf16 %v1013_v24 }
 0x2a7   :  { %v387_v44 = vmul.f32 %v1046_v33, %v386_v40  ;;  %956 = vmatmul.msk.f32.vlgmr.msra.gmra.mxu3 %vm206_vm3, %v310_v42 }
 0x2a8   :  { %508 = vmatpush.msra.mxu3 %v1004_v43 }
 0x2a9   :  { %v388_v48 = vadd.f32 %v1046_v33, %v387_v44  ;;  %v648_v49 = vpop.xlane.xlu0 %647 }
 0x2aa   :  { %1049 = vrcp.f32 %v648_v49  ;;  %v1048_v51 = vpop.eup %1047  ;;  %509 = vmatpush.msra.mxu3 %v1005_v47  ;;  %v660_v9 = vand.u32 2147483648, %v648_v49  ;;  %vm654_vm8 = vweird.f32 %v648_v49  ;;  %v658_v12 = vand.u32 2147483647, %v648_v49 }
 0x2ab   :  { %v392_v52 = vsel %vm391_vm14, %v1046_v33, %v388_v48  ;;  %v471_v39 = vmul.f32 %v1048_v51, %v469_v38  ;;  %vm476_vm1 = vweird.f32 %v1048_v51 }
 0x2ac   :  { %v397_v53 = vsel %vm394_vm15, %v396_v50, %v392_v52  ;;  %vm477_vm5 = vmor %vm475_vm4, %vm476_vm1  ;;  %v661_v16 = vor.u32 1.1754944e-38, %v660_v9  ;;  %vm659_vm10 = vcmp.eq.f32.partialorder %v658_v12, 8.507059e+37 }
 0x2ad   :  { %v398_v54 = vmul.f32 %v1322_v45, %v397_v53  ;;  %v472_v55 = vsub.f32 1.0, %v471_v39 }
 0x2af   :  { %v473_v59 = vmul.f32 %v1048_v51, %v472_v55  ;;  %960 = vmatmul.msk.f32.vlgmr.msrb.gmra.mxu3 %vm206_vm3, %v398_v54 }
 0x2b0   :  { %v1050_v58 = vpop.eup %1049 }
 0x2b1   :  { %v650_v61 = vmul.f32 %v1050_v58, %v648_v49  ;;  %v568_v62 = vpop.xlane.xlu0 %567  ;;  %v474_v63 = vadd.f32 %v1048_v51, %v473_v59  ;;  %vm655_vm7 = vweird.f32 %v1050_v58 }
 0x2b2   :  { %1051 = vrcp.f32 %v568_v62  ;;  %vm656_vm9 = vmor %vm654_vm8, %vm655_vm7  ;;  %v578_v2 = vand.u32 2147483647, %v568_v62  ;;  %v580_v19 = vand.u32 2147483648, %v568_v62  ;;  %vm574_vm12 = vweird.f32 %v568_v62 }
 0x2b3   :  { %v651_v3 = vsub.f32 1.0, %v650_v61  ;;  %v478_v4 = vsel %vm477_vm5, %v1048_v51, %v474_v63 }
 0x2b4   :  { %v483_v5 = vsel %vm480_vm6, %v482_v0, %v478_v4  ;;  %v581_v28 = vor.u32 1.1754944e-38, %v580_v19  ;;  %vm579_vm14 = vcmp.eq.f32.partialorder %v578_v2, 8.507059e+37  ;;  %v884_v4 = vld [vmem:[%s1408_s8 + $0x10] sm:$0xff] }
 0x2b5   :  { %v652_v45 = vmul.f32 %v1050_v58, %v651_v3  ;;  %v484_v6 = vmul.f32 %v1326_v57, %v483_v5  ;;  %v885_v3 = vld [vmem:[%s1408_s8 + $0x18] sm:$0xff]  ;;  %v883_v5 = vld [vmem:[%s1408_s8 + $0x8] sm:$0xff] }
 0x2b6   :  { %908 = vmatpush.msrb.mxu0 %v885_v3 }
 0x2b7   :  { %v653_v8 = vadd.f32 %v1050_v58, %v652_v45  ;;  %964 = vmatmul.msk.f32.vlgmr.msra.gmra.mxu3 %vm206_vm3, %v484_v6  ;;  %v882_v45 = vld [vmem:[%s1408_s8] sm:$0xff] }
 0x2b8   :  { %v1052_v10 = vpop.eup %1051  ;;  %909 = vmatpush.msrb.mxu0 %v884_v4 }
 0x2b9   :  { %v570_v13 = vmul.f32 %v1052_v10, %v568_v62  ;;  %v822_v14 = vpop.xlane.xlu0 %821  ;;  %v657_v15 = vsel %vm656_vm9, %v1050_v58, %v653_v8  ;;  %vm575_vm11 = vweird.f32 %v1052_v10 }
 0x2ba   :  { %1053 = vrcp.f32 %v822_v14  ;;  %v662_v21 = vsel %vm659_vm10, %v661_v16, %v657_v15  ;;  %vm576_vm13 = vmor %vm574_vm12, %vm575_vm11  ;;  %v834_v37 = vand.u32 2147483648, %v822_v14  ;;  %v832_v40 = vand.u32 2147483647, %v822_v14  ;;  %910 = vmatpush.msrb.mxu0 %v883_v5 }
 0x2bb   :  { %v571_v17 = vsub.f32 1.0, %v570_v13  ;;  %v1008_v20 = vpop.permute.xlu1 %1007  ;;  %v663_v29 = vmul.f32 %v1330_v1, %v662_v21  ;;  %vm828_vm1 = vweird.f32 %v822_v14  ;;  %vm528_vm10 = vcmask 195584  }
 0x2bc   :  { %v1009_v23 = vunpack.i.l.bf16 %v1008_v20  ;;  %v1010_v26 = vunpack.i.h.bf16 %v1008_v20  ;;  %v835_v42 = vor.u32 1.1754944e-38, %v834_v37  ;;  %vm833_vm5 = vcmp.eq.f32.partialorder %v832_v40, 8.507059e+37  ;;  %911 = vmatpush.msrb.mxu0 %v882_v45  ;;  %v1024_v20 = vld [vmem:[%s1409_s9] ss:$0 sm:$0xff] }
 0x2bd   :  { %v572_v57 = vmul.f32 %v1052_v10, %v571_v17 }
 0x2be   :  { %689 = vmatpush.msrb.mxu3 %v1009_v23 }
 0x2bf   :  { %v573_v25 = vadd.f32 %v1052_v10, %v572_v57 }
 0x2c0   :  { %v1054_v27 = vpop.eup %1053  ;;  %690 = vmatpush.msrb.mxu3 %v1010_v26 }
 0x2c1   :  { %v577_v31 = vsel %vm576_vm13, %v1052_v10, %v573_v25  ;;  %v824_v32 = vmul.f32 %v1054_v27, %v822_v14  ;;  %v736_v33 = vpop.xlane.xlu0 %735  ;;  %972 = vmatmul.msk.f32.vlgmr.msrb.gmra.mxu3 %vm206_vm3, %v663_v29  ;;  %vm829_vm15 = vweird.f32 %v1054_v27 }
 0x2c2   :  { %v582_v34 = vsel %vm579_vm14, %v581_v28, %v577_v31  ;;  %1055 = vrcp.f32 %v736_v33  ;;  %861 = vmatpush.msra.mxu3 %v1014_v30  ;;  %vm830_vm4 = vmor %vm828_vm1, %vm829_vm15  ;;  %v748_v50 = vand.u32 2147483648, %v736_v33  ;;  %vm742_vm7 = vweird.f32 %v736_v33 }
 0x2c3   :  { %v825_v36 = vsub.f32 1.0, %v824_v32  ;;  %v583_v7 = vmul.f32 %v1338_v11, %v582_v34  ;;  %v746_v51 = vand.u32 2147483647, %v736_v33 }
 0x2c4   :  { %862 = vmatpush.msra.mxu3 %v1015_v35  ;;  %v749_v53 = vor.u32 1.1754944e-38, %v748_v50 }
 0x2c5   :  { %v826_v38 = vmul.f32 %v1054_v27, %v825_v36  ;;  %968 = vmatmul.msk.f32.vlgmr.msra.gmra.mxu1 %vm206_vm3, %v583_v7  ;;  %vm747_vm9 = vcmp.eq.f32.partialorder %v746_v51, 8.507059e+37 }
 0x2c7   :  { %v827_v1 = vadd.f32 %v1054_v27, %v826_v38 }
 0x2c8   :  { %v1056_v41 = vpop.eup %1055 }
 0x2c9   :  { %v831_v43 = vsel %vm830_vm4, %v1054_v27, %v827_v1  ;;  %v738_v44 = vmul.f32 %v1056_v41, %v736_v33  ;;  %vm743_vm6 = vweird.f32 %v1056_v41 }
 0x2ca   :  { %v836_v46 = vsel %vm833_vm5, %v835_v42, %v831_v43  ;;  %vm744_vm8 = vmor %vm742_vm7, %vm743_vm6 }
 0x2cb   :  { %v739_v47 = vsub.f32 1.0, %v738_v44  ;;  %v837_v48 = vmul.f32 %v1345_v18, %v836_v46  ;;  %v251_v18 = vpop.f32.mrf.mxu3 }
 0x2cd   :  { %v740_v11 = vmul.f32 %v1056_v41, %v739_v47  ;;  %980 = vmatmul.msk.f32.vlgmr.msra.gmra.mxu3 %vm206_vm3, %v837_v48 }
 0x2cf   :  { %v741_v49 = vadd.f32 %v1056_v41, %v740_v11 }
 0x2d1   :  { %v745_v52 = vsel %vm744_vm8, %v1056_v41, %v741_v49 }
 0x2d2   :  { %v750_v54 = vsel %vm747_vm9, %v749_v53, %v745_v52 }
 0x2d3   :  { %v751_v58 = vmul.f32 %v1349_v22, %v750_v54 }
 0x2d4   :  { %v1018_v39 = vpop.permute.xlu0 %1017 }
 0x2d5   :  { %v1019_v55 = vunpack.i.l.bf16 %v1018_v39  ;;  %v1020_v56 = vunpack.i.h.bf16 %v1018_v39 }
 0x2d7   :  { %775 = vmatpush.msrb.mxu1 %v1019_v55 }
 0x2d9   :  { %776 = vmatpush.msrb.mxu1 %v1020_v56 }
 0x2da   :  { %976 = vmatmul.msk.f32.vlgmr.msrb.gmra.mxu1 %vm206_vm3, %v751_v58 }
 0x32a   :  { %v339_v59 = vpop.f32.mrf.mxu3 }
 0x32b   :  { %515 = vrot.lane.b32.xlu1 %v339_v59, %s1086_s7 }
 0x332   :  { %v425_v60 = vpop.f32.mrf.mxu3 }
 0x333   :  { %519 = vrot.lane.b32.xlu2 %v425_v60, %s1087_s4 }
 0x33a   :  { %v511_v61 = vpop.f32.mrf.mxu3 }
 0x33b   :  { %523 = vrot.lane.b32.xlu1 %v511_v61, %s1088_s25 }
 0x342   :  { %v604_v63 = vpop.f32.mrf.mxu1 }
 0x344   :  { %v692_v62 = vpop.f32.mrf.mxu3 }
 0x345   :  { %868 = vrot.lane.b32.xlu2 %v692_v62, %s1086_s7 }
 0x350   :  { %v864_v0 = vpop.f32.mrf.mxu3 }
 0x351   :  { %876 = vrot.lane.b32.xlu0 %v864_v0, %s1088_s25 }
 0x357   :  { %v778_v22 = vpop.f32.mrf.mxu1 }
 0x358   :  { %872 = vrot.lane.b32.xlu1 %v778_v22, %s1087_s4 }
 0x38d   :  { %v520_v9 = vpop.permute.xlu2 %519 }
 0x39d   :  { %v516_v6 = vpop.permute.xlu1 %515 }
 0x39e   :  { %v526_v8 = vsel %vm175_vm2, %v251_v18, %v516_v6 }
 0x39f   :  { %v527_v10 = vsel %vm206_vm3, %v526_v8, %v520_v9  ;;  %v869_v14 = vpop.permute.xlu2 %868 }
 0x3a0   :  { %v879_v15 = vsel %vm175_vm2, %v604_v63, %v869_v14 }
 0x3ad   :  { %v524_v12 = vpop.permute.xlu1 %523 }
 0x3ae   :  { %v529_v13 = vsel %vm528_vm10, %v527_v10, %v524_v12 }
 0x3af   :  { %981 = vmatmul.msk.f32.vlgmr.msrb.gmra.mxu0 %vm50_vm0, %v529_v13 }
 0x3c3   :  { %v877_v17 = vpop.permute.xlu0 %876 }
 0x3ca   :  { %v873_v16 = vpop.permute.xlu1 %872 }
 0x3cb   :  { %v880_v2 = vsel %vm206_vm3, %v879_v15, %v873_v16 }
 0x3cc   :  { %v881_v19 = vsel %vm528_vm10, %v880_v2, %v877_v17 }
 0x3cd   :  { %982 = vmatmul.msk.f32.gmra.mxu0 %vm50_vm0, %v881_v19 }
 0x42c   :  { %v913_v21 = vpop.f32.mrf.mxu0 }
 0x42d   :  { %v914_v57 = vadd.f32 %v1024_v20, %v913_v21 }
 0x42f   :  { %919 = vst.msk [vmem:[#allocation2] sm:$0xff] %vm50_vm0, %v914_v57 }
 0x44a   :  { %v916_v23 = vpop.f32.mrf.mxu0 }
 0x44b   :  { %v917_v24 = vadd.f32 %v1024_v20, %v916_v23 }
 0x44d   :  { %920 = vst.msk [vmem:[#allocation2 + $0x8] sm:$0xff] %vm50_vm0, %v917_v24 }
 0x44e   :  { %933 = dma.vmem_to_hbm [thread:$0]  %s926_s15, 256, %s928_s13, [#allocation3], %s1090_s16, %s1090_s16, %s1086_s7  }
 0x44f   :  { %1081 = dma.done.wait [#allocation3], 256  }
 0x450   :  { %1082 = vsyncadd [#allocation3], 4294967040 }
 0x451   :  { %938 = vsyncpa [#allocation3], 1 }

</bundles_post_ra>
